<compile_context>
chip_gen: v6e
topology: v6e:2x2x1
jax: 0.10.0
libtpu: 0.0.40
codegen_flags: <defaults>
</compile_context>

<pallas_src>
import jax
import jax.numpy as jnp
from jax.experimental import pallas as pl
from jax.experimental.pallas import tpu as pltpu


_LANE = 128       # TPU lane width
_MAX_TC = 2048    # CHW (lane-axis) tile size target, multiple of 128
_MAX_TN = 256     # batch (sublane-axis) tile size target, multiple of 8


def _round_up(x, m):
    return (x + m - 1) // m * m


def _cdiv(a, b):
    return -(-a // b)


def _mse_partial_kernel(x_ref, t_ref, o_ref, acc_ref):
    """Accumulate per-row sums of squared error over the CHW (reduction) axis.

    x_ref, t_ref : (TN, TC)  input tiles
    o_ref        : (TN, 128) lane-dense per-row raw SSE (written once per batch tile)
    acc_ref      : (TN, 128) f32 VMEM scratch accumulator
    """
    k = pl.program_id(1)

    @pl.when(k == 0)
    def _init():
        acc_ref[...] = jnp.zeros_like(acc_ref)

    d = x_ref[...].astype(jnp.float32) - t_ref[...].astype(jnp.float32)
    # Raw partial sum over this CHW tile, per batch row -> (TN, 1); broadcast-add
    # into the lane-dense accumulator (every lane carries the same running sum,
    # which keeps the single final store full-width / unmasked).
    acc_ref[...] += jnp.sum(d * d, axis=1, keepdims=True)

    @pl.when(k == pl.num_programs(1) - 1)
    def _finalize():
        o_ref[...] = acc_ref[...]


def mse_loss(inputs, targets, fvalid):
    """Equivalent of the PyTorch MSELoss module's forward (NCHW inputs)."""
    n, c, h, w = inputs.shape
    chw = c * h * w

    x2 = inputs.reshape(n, chw)
    t2 = targets.reshape(n, chw)

    # --- tile selection -----------------------------------------------------
    # CHW (lane) axis: multiples of 128, ~2K elements per tile, minimal padding.
    chw_128 = _round_up(chw, _LANE)
    kc = max(1, _cdiv(chw_128, _MAX_TC))          # number of CHW tiles
    tc = _round_up(_cdiv(chw_128, kc), _LANE)     # per-tile CHW width
    chw_p = kc * tc

    # Batch (sublane) axis: whole batch if small, else ~256-row tiles (mult of 8).
    if n <= _MAX_TN:
        tn, n_p = n, n
    else:
        kn = _cdiv(n, _MAX_TN)
        tn = _round_up(_cdiv(n, kn), 8)
        n_p = kn * tn

    if (n_p, chw_p) != (n, chw):
        # Zero padding contributes 0 to the squared-error sums; padded batch
        # rows are sliced off in the epilogue.
        x2 = jnp.pad(x2, ((0, n_p - n), (0, chw_p - chw)))
        t2 = jnp.pad(t2, ((0, n_p - n), (0, chw_p - chw)))

    grid = (n_p // tn, chw_p // tc)
    itemsize = jnp.dtype(inputs.dtype).itemsize

    partial = pl.pallas_call(
        _mse_partial_kernel,
        out_shape=jax.ShapeDtypeStruct((n_p, _LANE), jnp.float32),
        grid_spec=pltpu.PrefetchScalarGridSpec(
            num_scalar_prefetch=0,
            grid=grid,
            in_specs=[
                pl.BlockSpec((tn, tc), lambda i, k: (i, k)),
                pl.BlockSpec((tn, tc), lambda i, k: (i, k)),
            ],
            out_specs=pl.BlockSpec((tn, _LANE), lambda i, k: (i, 0)),
            scratch_shapes=[pltpu.VMEM((tn, _LANE), jnp.float32)],
        ),
        compiler_params=pltpu.CompilerParams(
            dimension_semantics=("parallel", "arbitrary"),
            vmem_limit_bytes=32 * 1024 * 1024,
        ),
        cost_estimate=pl.CostEstimate(
            flops=3 * n_p * chw_p,
            transcendentals=0,
            bytes_accessed=2 * n_p * chw_p * itemsize + n_p * _LANE * 4,
        ),
    )(x2, t2)

    # Tiny N-element epilogue: mean over CHW, weight by FVaild, mean over batch.
    per_batch_sse = partial[:n, 0]
    per_batch_mse = per_batch_sse * (1.0 / chw)
    return jnp.mean(per_batch_mse * fvalid.astype(jnp.float32))


if __name__ == "__main__":
    key = jax.random.PRNGKey(0)
    k1, k2, k3 = jax.random.split(key, 3)

    # Small NCHW shapes consistent with the module's forward.
    N, C, H, W = 2, 4, 16, 16
    inputs = jax.random.normal(k1, (N, C, H, W), dtype=jnp.float32)
    targets = jax.random.normal(k2, (N, C, H, W), dtype=jnp.float32)
    fvalid = jax.random.uniform(k3, (N,), dtype=jnp.float32)

    loss = jax.block_until_ready(jax.jit(mse_loss)(inputs, targets, fvalid))

    # Pure-JAX reference check (same semantics as the PyTorch module).
    ref = jnp.mean(jnp.mean((inputs - targets) ** 2, axis=(1, 2, 3)) * fvalid)
    assert jnp.allclose(loss, ref, rtol=1e-5, atol=1e-6), (loss, ref)

    print("KERNEL_OK")
</pallas_src>

<mosaic_0001>
module attributes {stable_mosaic.version = 11 : i64} {
  func.func @_mse_partial_kernel(%arg0: i32, %arg1: i32, %arg2: memref<2x1024xf32, #tpu.memory_space<vmem>>, %arg3: memref<2x1024xf32, #tpu.memory_space<vmem>>, %arg4: memref<2x128xf32, #tpu.memory_space<vmem>>, %arg5: memref<2x128xf32, #tpu.memory_space<vmem>>) attributes {dimension_semantics = [#tpu.dimension_semantics<parallel>, #tpu.dimension_semantics<arbitrary>], iteration_bounds = array<i64: 1, 1>, scalar_prefetch = 0 : i64, scratch_operands = 1 : i64, tpu.core_type = #tpu.core_type<tc>, window_params = [{transform_indices = @transform_0, window_bounds = array<i64: 2, 1024>}, {transform_indices = @transform_1, window_bounds = array<i64: 2, 1024>}, {transform_indices = @transform_2, window_bounds = array<i64: 2, 128>}]} {
    %c0_i32 = arith.constant 0 : i32
    %0 = arith.cmpi eq, %arg1, %c0_i32 : i32
    %1 = arith.extui %0 : i1 to i32
    %c0_i32_0 = arith.constant 0 : i32
    %2 = arith.cmpi ne, %1, %c0_i32_0 : i32
    scf.if %2 {
      %cst_10 = arith.constant 0.000000e+00 : f32
      %16 = vector.broadcast %cst_10 : f32 to vector<2x128xf32>
      %c0_11 = arith.constant 0 : index
      %c0_12 = arith.constant 0 : index
      %17 = vector.load %arg5[%c0_11, %c0_12] : memref<2x128xf32, #tpu.memory_space<vmem>>, vector<2x128xf32>
      tpu.vector_store %arg5[%c0_11, %c0_12], %16 {strides = array<i32>} : memref<2x128xf32, #tpu.memory_space<vmem>>, vector<2x128xf32>,
    } else {
    }
    %c0 = arith.constant 0 : index
    %c0_1 = arith.constant 0 : index
    %3 = vector.load %arg2[%c0, %c0_1] : memref<2x1024xf32, #tpu.memory_space<vmem>>, vector<2x1024xf32>
    %c0_2 = arith.constant 0 : index
    %c0_3 = arith.constant 0 : index
    %4 = vector.load %arg3[%c0_2, %c0_3] : memref<2x1024xf32, #tpu.memory_space<vmem>>, vector<2x1024xf32>
    %5 = arith.subf %3, %4 : vector<2x1024xf32>
    %c0_4 = arith.constant 0 : index
    %c0_5 = arith.constant 0 : index
    %6 = vector.load %arg5[%c0_4, %c0_5] : memref<2x128xf32, #tpu.memory_space<vmem>>, vector<2x128xf32>
    %7 = arith.mulf %5, %5 : vector<2x1024xf32>
    %cst = arith.constant dense<0.000000e+00> : vector<2xf32>
    %8 = vector.multi_reduction <add>, %7, %cst [1] : vector<2x1024xf32> to vector<2xf32>
    %9 = vector.shape_cast %8 : vector<2xf32> to vector<2x1xf32>
    %10 = vector.broadcast %9 : vector<2x1xf32> to vector<2x128xf32>
    %11 = arith.addf %6, %10 : vector<2x128xf32>
    %c0_6 = arith.constant 0 : index
    %c0_7 = arith.constant 0 : index
    %12 = vector.load %arg5[%c0_6, %c0_7] : memref<2x128xf32, #tpu.memory_space<vmem>>, vector<2x128xf32>
    tpu.vector_store %arg5[%c0_6, %c0_7], %11 {strides = array<i32>} : memref<2x128xf32, #tpu.memory_space<vmem>>, vector<2x128xf32>,
    %c0_i32_8 = arith.constant 0 : i32
    %13 = arith.cmpi eq, %arg1, %c0_i32_8 : i32
    %14 = arith.extui %13 : i1 to i32
    %c0_i32_9 = arith.constant 0 : i32
    %15 = arith.cmpi ne, %14, %c0_i32_9 : i32
    scf.if %15 {
      %c0_10 = arith.constant 0 : index
      %c0_11 = arith.constant 0 : index
      %16 = vector.load %arg5[%c0_10, %c0_11] : memref<2x128xf32, #tpu.memory_space<vmem>>, vector<2x128xf32>
      %c0_12 = arith.constant 0 : index
      %c0_13 = arith.constant 0 : index
      %17 = vector.load %arg4[%c0_12, %c0_13] : memref<2x128xf32, #tpu.memory_space<vmem>>, vector<2x128xf32>
      tpu.vector_store %arg4[%c0_12, %c0_13], %16 {strides = array<i32>} : memref<2x128xf32, #tpu.memory_space<vmem>>, vector<2x128xf32>,
    } else {
    }
    return
  }
  func.func @transform_0(%arg0: i32, %arg1: i32) -> (i32, i32) {
    %c0_i32 = arith.constant 0 : i32
    return %arg0, %arg1 : i32, i32
  }
  func.func @transform_1(%arg0: i32, %arg1: i32) -> (i32, i32) {
    %c0_i32 = arith.constant 0 : i32
    return %arg0, %arg1 : i32, i32
  }
  func.func @transform_2(%arg0: i32, %arg1: i32) -> (i32, i32) {
    %c0_i32 = arith.constant 0 : i32
    %c0_i32_0 = arith.constant 0 : i32
    return %arg0, %c0_i32 : i32, i32
  }
}

</mosaic_0001>

<bundles_post_ra>
// kernel: mse_loss.1
= control target key start
LH: loop header
LB: loop body
LE: loop exit
PB: predicated region body
PF: predicated region fallthrough
CT: control target
= control target key end

     0   :  { %v31_v0 = vlaneseq  ;;  %v100_v4 = vmov 1983009808   ;;  %v101_v6 = vmov 0.0   ;;  %vm69_vm0 = vcmask 1041408   ;;  %s140_s0 = inlined_call_operand.vmem [shape: f32[2,1024], index: 0, kind: input, shape index: {}]   ;;  %s141_s1 = inlined_call_operand.vmem [shape: f32[2,1024], index: 1, kind: input, shape index: {}]   ;;  %s142_s2 = inlined_call_operand.vmem [shape: f32[2,128], index: 2, kind: output, shape index: {}]  }
   0x1   :  { %v16_v1 = vld [vmem:[%s140_s0] sm:$0xff]  ;;  %v17_v2 = vld [vmem:[%s140_s0 + $0x8] sm:$0xff]  ;;  %v29_v5 = vunpack.c.l.s4 %v100_v4  ;;  %15 = vst [vmem:[#allocation2] sm:$0x3] %v101_v6 }
   0x2   :  { %v18_v3 = vld [vmem:[%s141_s1] sm:$0xff]  ;;  %v19_v7 = vld [vmem:[%s141_s1 + $0x8] sm:$0xff]  ;;  %v32_v9 = vshrl.u32 %v31_v0, 7 }
   0x3   :  { %v20_v8 = vsub.f32 %v16_v1, %v18_v3  ;;  %v21_v10 = vsub.f32 %v17_v2, %v19_v7  ;;  %v30_v11 = vunpack.c.0.s8 %v29_v5 }
   0x5   :  { %v23_v12 = vmul.f32 %v20_v8, %v20_v8  ;;  %v24_v13 = vmul.f32 %v21_v10, %v21_v10  ;;  %v33_v14 = vsub.s32 %v30_v11, %v32_v9 }
   0x7   :  { %v27_v15 = vcombine.high %v23_v12, %v23_v12  ;;  %v34_v16 = vrot.slane %v23_v12, %v33_v14  ;;  %v44_v19 = vcombine.high %v24_v13, %v24_v13  ;;  %v51_v20 = vrot.slane %v24_v13, %v33_v14 }
   0x8   :  { %v22_v40 = vld [vmem:[#allocation2] sm:$0x3] }
   0x9   :  { %v41_v17 = vrot.slane %v27_v15, %v33_v14  ;;  %v42_v18 = vcombine.high %v34_v16, %v34_v16  ;;  %v70_v21 = vsel %vm69_vm0, %v34_v16, 0.0  ;;  %v58_v26 = vrot.slane %v44_v19, %v33_v14 }
   0xa   :  { %v59_v27 = vcombine.high %v51_v20, %v51_v20  ;;  %v77_v30 = vsel %vm69_vm0, %v51_v20, 0.0 }
   0xb   :  { %v43_v22 = vcombine.high %v41_v17, %v41_v17  ;;  %v71_v23 = vsel %vm69_vm0, %v42_v18, 0.0  ;;  %v73_v24 = vsel %vm69_vm0, %v41_v17, 0.0  ;;  %v60_v32 = vcombine.high %v58_v26, %v58_v26 }
   0xc   :  { %v72_v25 = vadd.f32 %v71_v23, %v70_v21  ;;  %v79_v33 = vsel %vm69_vm0, %v59_v27, 0.0  ;;  %v81_v35 = vsel %vm69_vm0, %v58_v26, 0.0 }
   0xd   :  { %v75_v28 = vsel %vm69_vm0, %v43_v22, 0.0  ;;  %v83_v37 = vsel %vm69_vm0, %v60_v32, 0.0 }
   0xe   :  { %v74_v29 = vadd.f32 %v73_v24, %v72_v25 }
  0x10   :  { %v76_v31 = vadd.f32 %v75_v28, %v74_v29 }
  0x12   :  { %v78_v34 = vadd.f32 %v77_v30, %v76_v31 }
  0x14   :  { %v80_v36 = vadd.f32 %v79_v33, %v78_v34 }
  0x16   :  { %v82_v38 = vadd.f32 %v81_v35, %v80_v36 }
  0x18   :  { %v84_v39 = vadd.f32 %v83_v37, %v82_v38 }
  0x1a   :  { %85 = vadd.xlane.f32.xlu0 %v84_v39 }
  0xa3   :  { %v86_v41 = vpop.xlane.xlu0 %85 }
  0xa4   :  { %v87_v42 = vadd.f32 %v86_v41, %v22_v40 }
  0xa6   :  { %88 = vst [vmem:[#allocation2] sm:$0x3] %v87_v42 }
  0xad   :  { %v92_v43 = vld [vmem:[#allocation2] sm:$0x3] }
  0xae   :  { %93 = vst [vmem:[%s142_s2] sm:$0x3] %v92_v43 }

</bundles_post_ra>
